<compile_context>
chip_gen: v7x
topology: tpu7x:2x2x1
jax: 0.10.0
libtpu: 0.0.40
codegen_flags: <defaults>
</compile_context>

<pallas_src>
import functools

import jax
import jax.numpy as jnp
from jax.experimental import pallas as pl
from jax.experimental.pallas import tpu as pltpu

LN_EPS = 1e-5


def _round_up(x: int, m: int) -> int:
    return (x + m - 1) // m * m


def _sublane(dtype) -> int:
    # sublane packing: 8 rows for 4-byte, 16 for 2-byte, 32 for 1-byte dtypes
    return max(8, 32 // jnp.dtype(dtype).itemsize)


def _spec(shape, index_map, *, buffers=None):
    """BlockSpec with an optional pipeline depth; falls back if unsupported."""
    if buffers is not None and hasattr(pl, "Buffered"):
        try:
            return pl.BlockSpec(shape, index_map, pipeline_mode=pl.Buffered(buffers))
        except TypeError:
            pass
    return pl.BlockSpec(shape, index_map)


def _vmem_ceiling() -> int:
    try:
        cap = int(pltpu.get_tpu_info().vmem_capacity_bytes)
    except Exception:
        cap = 64 * 1024 * 1024  # conservative (v7x per-TC size)
    return int(0.78 * cap)


# ----------------------------------------------------------------------------
# Kernels
# ----------------------------------------------------------------------------
def _residual_ln_kernel(x_ref, w_ref, b_ref, gamma_ref, beta_ref, o_ref,
                        *, inv_d, matmul_dtype):
    # x_ref:     (TM, D)  residual-input token tile (native dtype)
    # w_ref:     (D, D)   sublayer Linear weight (resident), layout y = x @ W
    # b_ref:     (1, D)   sublayer Linear bias  (f32, resident)
    # gamma_ref: (1, D)   LayerNorm scale       (f32, resident)
    # beta_ref:  (1, D)   LayerNorm shift       (f32, resident)
    x = x_ref[...]

    # --- sublayer Linear on the MXU (optionally bf16 operands), f32 acc ---
    y = jnp.dot(x.astype(matmul_dtype), w_ref[...],
                preferred_element_type=jnp.float32)

    # --- dropout (eval => identity) + residual + bias, all in f32 ---
    h = x.astype(jnp.float32) + y + b_ref[...]

    # --- LayerNorm over last dim (sum * 1/D instead of mean divides) ---
    mean = h.sum(axis=-1, keepdims=True) * inv_d
    h = h - mean
    var = (h * h).sum(axis=-1, keepdims=True) * inv_d
    h = h * jax.lax.rsqrt(var + LN_EPS)

    o_ref[...] = (h * gamma_ref[...] + beta_ref[...]).astype(o_ref.dtype)


def _residual_ln_kernel_ktiled(xk_ref, xfull_ref, w_ref, b_ref, gamma_ref,
                               beta_ref, o_ref, acc_ref, *, inv_d, matmul_dtype):
    # Streaming-weight path: grid = (token tiles, K tiles).
    # xk_ref:   (TM, TK)  K-slice of the token tile (MXU operand)
    # xfull_ref:(TM, D)   full-width token tile (residual add; resident over k)
    # w_ref:    (TK, D)   row band of the weight (streamed, double-buffered)
    # acc_ref:  (TM, D)   f32 accumulator scratch
    k = pl.program_id(1)

    @pl.when(k == 0)
    def _():
        acc_ref[...] = jnp.zeros_like(acc_ref)

    acc_ref[...] += jnp.dot(xk_ref[...].astype(matmul_dtype), w_ref[...],
                            preferred_element_type=jnp.float32)

    @pl.when(k == pl.num_programs(1) - 1)
    def _():
        h = acc_ref[...] + xfull_ref[...].astype(jnp.float32) + b_ref[...]
        mean = h.sum(axis=-1, keepdims=True) * inv_d
        h = h - mean
        var = (h * h).sum(axis=-1, keepdims=True) * inv_d
        h = h * jax.lax.rsqrt(var + LN_EPS)
        o_ref[...] = (h * gamma_ref[...] + beta_ref[...]).astype(o_ref.dtype)


# ----------------------------------------------------------------------------
# Wrapper
# ----------------------------------------------------------------------------
def _pick_tm(D, M, sub, tm):
    if tm is not None:
        return min(_round_up(tm, sub), _round_up(M, sub))
    if D >= 4096:
        tm_eff = 256
    elif D >= 2048:
        tm_eff = 512
    else:
        tm_eff = 1024                      # amortize ~0.35us/step at small D
    tm_eff = min(tm_eff, _round_up(M, sub))
    # keep >= 2 grid steps when M allows (v7x megacore: 2 TCs over "parallel")
    if pl.cdiv(M, tm_eff) < 2 and M >= 2 * sub:
        tm_eff = _round_up(pl.cdiv(M, 2), sub)
    return tm_eff


def _pick_tk(D, tk, itemsize, ceiling):
    if tk is not None:
        return tk if (D % tk == 0 and tk % 128 == 0) else None
    for cand in (1024, 512, 256, 128):
        if D % cand == 0 and 2 * cand * D * itemsize <= ceiling // 4:
            return cand
    return None


def residual_forward(x, w, b, gamma, beta, *, tm=None, tk=None,
                     matmul_dtype=None, force_weight_streaming=False):
    """out = LayerNorm(x + Linear(x)).  x: (B, S, D) -> (B, S, D)."""
    B, S, D = x.shape
    M = B * S
    x2 = x.reshape(M, D)
    x_dt = jnp.dtype(x.dtype)

    md = jnp.dtype(matmul_dtype) if matmul_dtype is not None else x_dt
    w_eff = w.astype(md)                    # pre-cast once (no per-step casts)

    sub = _sublane(x_dt)
    tm_eff = _pick_tm(D, M, sub, tm)
    nm = pl.cdiv(M, tm_eff)

    # Per-row parameters pre-cast to f32 once.
    b2 = b.reshape(1, D).astype(jnp.float32)
    g2 = gamma.reshape(1, D).astype(jnp.float32)
    be2 = beta.reshape(1, D).astype(jnp.float32)

    ceiling = _vmem_ceiling()
    w_bytes = D * D * md.itemsize
    inv_d = 1.0 / float(D)

    cost = pl.CostEstimate(
        flops=2 * M * D * D + 8 * M * D,
        transcendentals=M,                                     # one rsqrt / row
        bytes_accessed=2 * M * D * x_dt.itemsize + w_bytes + 3 * D * 4,
    )

    use_streaming = force_weight_streaming or (w_bytes > 0.35 * ceiling)
    tk_eff = _pick_tk(D, tk, md.itemsize, ceiling) if use_streaming else None
    if use_streaming and tk_eff is None:
        use_streaming = False               # cannot K-tile cleanly; stay resident

    if not use_streaming:
        # --- resident-weight path -------------------------------------------
        io_bytes = 2 * 2 * tm_eff * D * x_dt.itemsize          # x + out, 2 bufs
        tmp_bytes = 2 * tm_eff * D * 4                          # f32 temporaries
        vec_bytes = 3 * 2 * D * 4
        budget = int(1.5 * (w_bytes + io_bytes + tmp_bytes + vec_bytes))
        vmem_limit = min(max(budget, 32 * 1024 * 1024), ceiling)

        kernel = functools.partial(_residual_ln_kernel, inv_d=inv_d,
                                   matmul_dtype=md)
        out2 = pl.pallas_call(
            kernel,
            out_shape=jax.ShapeDtypeStruct((M, D), x_dt),
            grid_spec=pltpu.PrefetchScalarGridSpec(
                num_scalar_prefetch=0,
                grid=(nm,),
                in_specs=[
                    pl.BlockSpec((tm_eff, D), lambda i: (i, 0)),      # x tile
                    _spec((D, D), lambda i: (0, 0), buffers=1),       # weight
                    _spec((1, D), lambda i: (0, 0), buffers=1),       # bias
                    _spec((1, D), lambda i: (0, 0), buffers=1),       # gamma
                    _spec((1, D), lambda i: (0, 0), buffers=1),       # beta
                ],
                out_specs=pl.BlockSpec((tm_eff, D), lambda i: (i, 0)),
            ),
            compiler_params=pltpu.CompilerParams(
                dimension_semantics=("parallel",),
                vmem_limit_bytes=vmem_limit,
            ),
            cost_estimate=cost,
        )(x2, w_eff, b2, g2, be2)
    else:
        # --- K-tiled streaming-weight path (large D / v7x) -------------------
        nk = D // tk_eff
        band_bytes = 2 * tk_eff * D * md.itemsize               # W band, 2 bufs
        io_bytes = (2 * tm_eff * tk_eff + 4 * tm_eff * D) * x_dt.itemsize
        acc_bytes = tm_eff * D * 4
        vec_bytes = 3 * 2 * D * 4
        budget = int(1.5 * (band_bytes + io_bytes + acc_bytes + vec_bytes))
        vmem_limit = min(max(budget, 32 * 1024 * 1024), ceiling)

        kernel = functools.partial(_residual_ln_kernel_ktiled, inv_d=inv_d,
                                   matmul_dtype=md)
        out2 = pl.pallas_call(
            kernel,
            out_shape=jax.ShapeDtypeStruct((M, D), x_dt),
            grid_spec=pltpu.PrefetchScalarGridSpec(
                num_scalar_prefetch=0,
                grid=(nm, nk),
                in_specs=[
                    pl.BlockSpec((tm_eff, tk_eff), lambda i, k: (i, k)),  # x (K slice)
                    pl.BlockSpec((tm_eff, D), lambda i, k: (i, 0)),       # x (full row)
                    pl.BlockSpec((tk_eff, D), lambda i, k: (k, 0)),       # W row band
                    _spec((1, D), lambda i, k: (0, 0), buffers=1),        # bias
                    _spec((1, D), lambda i, k: (0, 0), buffers=1),        # gamma
                    _spec((1, D), lambda i, k: (0, 0), buffers=1),        # beta
                ],
                out_specs=pl.BlockSpec((tm_eff, D), lambda i, k: (i, 0)),
                scratch_shapes=[pltpu.VMEM((tm_eff, D), jnp.float32)],
            ),
            compiler_params=pltpu.CompilerParams(
                dimension_semantics=("parallel", "arbitrary"),
                vmem_limit_bytes=vmem_limit,
            ),
            cost_estimate=cost,
        )(x2, x2, w_eff, b2, g2, be2)

    return out2.reshape(B, S, D)


# ----------------------------------------------------------------------------
# Reference + tests
# ----------------------------------------------------------------------------
def residual_reference(x, w, b, gamma, beta):
    y = jnp.einsum("bsd,de->bse", x.astype(jnp.float32), w.astype(jnp.float32),
                   precision=jax.lax.Precision.HIGHEST) + b
    h = x.astype(jnp.float32) + y
    mean = jnp.mean(h, axis=-1, keepdims=True)
    var = jnp.mean((h - mean) ** 2, axis=-1, keepdims=True)
    normed = (h - mean) * jax.lax.rsqrt(var + LN_EPS)
    return (normed * gamma + beta).astype(x.dtype)


if __name__ == "__main__":
    key = jax.random.PRNGKey(0)
    B, S, D = 2, 8, 32
    k1, k2, k3, k4, k5, k6 = jax.random.split(key, 6)

    x = jax.random.normal(k1, (B, S, D), dtype=jnp.float32)
    w = jax.random.normal(k2, (D, D), dtype=jnp.float32) * (1.0 / jnp.sqrt(D))
    b = jax.random.normal(k3, (D,), dtype=jnp.float32) * 0.01
    gamma = jnp.ones((D,), dtype=jnp.float32)      # PyTorch LayerNorm init
    beta = jnp.zeros((D,), dtype=jnp.float32)

    ref = residual_reference(x, w, b, gamma, beta)

    # Resident-weight path, auto tile.
    out = jax.block_until_ready(residual_forward(x, w, b, gamma, beta))
    assert out.shape == (B, S, D)
    assert jnp.allclose(out, ref, atol=1e-2, rtol=1e-2)

    # Multi-step token grid (pipelined / megacore-shardable path).
    out_t = jax.block_until_ready(residual_forward(x, w, b, gamma, beta, tm=8))
    assert jnp.allclose(out_t, ref, atol=1e-2, rtol=1e-2)

    # Ragged token count: partial last block masked by Pallas (no pad/slice).
    xr = jax.random.normal(k4, (B, 13, D), dtype=jnp.float32)
    out_r = jax.block_until_ready(residual_forward(xr, w, b, gamma, beta, tm=8))
    ref_r = residual_reference(xr, w, b, gamma, beta)
    assert jnp.allclose(out_r, ref_r, atol=1e-2, rtol=1e-2)

    # K-tiled streaming-weight path (forced at a small shape; auto for large D).
    D2 = 256
    x2 = jax.random.normal(k5, (B, S, D2), dtype=jnp.float32)
    w2 = jax.random.normal(k6, (D2, D2), dtype=jnp.float32) * (1.0 / jnp.sqrt(D2))
    b2 = jnp.zeros((D2,), dtype=jnp.float32)
    g2 = jnp.ones((D2,), dtype=jnp.float32)
    be2 = jnp.zeros((D2,), dtype=jnp.float32)
    ref2 = residual_reference(x2, w2, b2, g2, be2)
    out2 = jax.block_until_ready(
        residual_forward(x2, w2, b2, g2, be2, force_weight_streaming=True, tk=128))
    assert jnp.allclose(out2, ref2, atol=1e-2, rtol=1e-2)

    # Opt-in bf16 MXU operands (v5e-friendly); f32 accumulation + f32 LayerNorm.
    out_bf = jax.block_until_ready(
        residual_forward(x, w, b, gamma, beta, matmul_dtype=jnp.bfloat16))
    assert jnp.allclose(out_bf, ref, atol=5e-2, rtol=5e-2)

    print("KERNEL_OK")
</pallas_src>

<mosaic_0001>
module attributes {stable_mosaic.version = 11 : i64} {
  func.func @_residual_ln_kernel(%arg0: i32, %arg1: memref<8x32xf32, #tpu.memory_space<vmem>>, %arg2: memref<32x32xf32, #tpu.memory_space<vmem>>, %arg3: memref<1x32xf32, #tpu.memory_space<vmem>>, %arg4: memref<1x32xf32, #tpu.memory_space<vmem>>, %arg5: memref<1x32xf32, #tpu.memory_space<vmem>>, %arg6: memref<8x32xf32, #tpu.memory_space<vmem>>) attributes {dimension_semantics = [#tpu.dimension_semantics<parallel>], iteration_bounds = array<i64: 2>, scalar_prefetch = 0 : i64, scratch_operands = 0 : i64, tpu.core_type = #tpu.core_type<tc>, window_params = [{transform_indices = @transform_0, window_bounds = array<i64: 8, 32>}, {pipeline_mode = #tpu.pipeline_mode<synchronous>, transform_indices = @transform_1, window_bounds = array<i64: 32, 32>}, {pipeline_mode = #tpu.pipeline_mode<synchronous>, transform_indices = @transform_2, window_bounds = array<i64: 1, 32>}, {pipeline_mode = #tpu.pipeline_mode<synchronous>, transform_indices = @transform_3, window_bounds = array<i64: 1, 32>}, {pipeline_mode = #tpu.pipeline_mode<synchronous>, transform_indices = @transform_4, window_bounds = array<i64: 1, 32>}, {transform_indices = @transform_5, window_bounds = array<i64: 8, 32>}]} {
    %c0 = arith.constant 0 : index
    %c0_0 = arith.constant 0 : index
    %0 = vector.load %arg1[%c0, %c0_0] : memref<8x32xf32, #tpu.memory_space<vmem>>, vector<8x32xf32>
    %c0_1 = arith.constant 0 : index
    %c0_2 = arith.constant 0 : index
    %1 = vector.load %arg2[%c0_1, %c0_2] : memref<32x32xf32, #tpu.memory_space<vmem>>, vector<32x32xf32>
    %cst = arith.constant dense<0.000000e+00> : vector<8x32xf32>
    %2 = tpu.matmul %0, %1, %cst {dimension_numbers = #tpu.dot_dimension_numbers<[1], [0], [0], [1], [0, 0, 1, 1], [], []>} : vector<8x32xf32>, vector<32x32xf32>, vector<8x32xf32> -> vector<8x32xf32>
    %3 = arith.addf %0, %2 : vector<8x32xf32>
    %c0_3 = arith.constant 0 : index
    %c0_4 = arith.constant 0 : index
    %4 = vector.load %arg3[%c0_3, %c0_4] : memref<1x32xf32, #tpu.memory_space<vmem>>, vector<1x32xf32>
    %5 = vector.broadcast %4 : vector<1x32xf32> to vector<8x32xf32>
    %6 = arith.addf %3, %5 : vector<8x32xf32>
    %cst_5 = arith.constant dense<0.000000e+00> : vector<8xf32>
    %7 = vector.multi_reduction <add>, %6, %cst_5 [1] : vector<8x32xf32> to vector<8xf32>
    %8 = vector.shape_cast %7 : vector<8xf32> to vector<8x1xf32>
    %cst_6 = arith.constant 3.125000e-02 : f32
    %9 = vector.broadcast %cst_6 : f32 to vector<8x1xf32>
    %10 = arith.mulf %8, %9 : vector<8x1xf32>
    %11 = vector.broadcast %10 : vector<8x1xf32> to vector<8x32xf32>
    %12 = arith.subf %6, %11 : vector<8x32xf32>
    %13 = arith.mulf %12, %12 : vector<8x32xf32>
    %cst_7 = arith.constant dense<0.000000e+00> : vector<8xf32>
    %14 = vector.multi_reduction <add>, %13, %cst_7 [1] : vector<8x32xf32> to vector<8xf32>
    %15 = vector.shape_cast %14 : vector<8xf32> to vector<8x1xf32>
    %cst_8 = arith.constant 3.125000e-02 : f32
    %16 = vector.broadcast %cst_8 : f32 to vector<8x1xf32>
    %17 = arith.mulf %15, %16 : vector<8x1xf32>
    %cst_9 = arith.constant 9.99999974E-6 : f32
    %18 = vector.broadcast %cst_9 : f32 to vector<8x1xf32>
    %19 = arith.addf %17, %18 : vector<8x1xf32>
    %20 = math.rsqrt %19 : vector<8x1xf32>
    %21 = vector.broadcast %20 : vector<8x1xf32> to vector<8x32xf32>
    %22 = arith.mulf %12, %21 : vector<8x32xf32>
    %c0_10 = arith.constant 0 : index
    %c0_11 = arith.constant 0 : index
    %23 = vector.load %arg4[%c0_10, %c0_11] : memref<1x32xf32, #tpu.memory_space<vmem>>, vector<1x32xf32>
    %24 = vector.broadcast %23 : vector<1x32xf32> to vector<8x32xf32>
    %25 = arith.mulf %22, %24 : vector<8x32xf32>
    %c0_12 = arith.constant 0 : index
    %c0_13 = arith.constant 0 : index
    %26 = vector.load %arg5[%c0_12, %c0_13] : memref<1x32xf32, #tpu.memory_space<vmem>>, vector<1x32xf32>
    %27 = vector.broadcast %26 : vector<1x32xf32> to vector<8x32xf32>
    %28 = arith.addf %25, %27 : vector<8x32xf32>
    %c0_14 = arith.constant 0 : index
    %c0_15 = arith.constant 0 : index
    %29 = vector.load %arg6[%c0_14, %c0_15] : memref<8x32xf32, #tpu.memory_space<vmem>>, vector<8x32xf32>
    tpu.vector_store %arg6[%c0_14, %c0_15], %28 {strides = array<i32>} : memref<8x32xf32, #tpu.memory_space<vmem>>, vector<8x32xf32>,
    return
  }
  func.func @transform_0(%arg0: i32) -> (i32, i32) {
    %c0_i32 = arith.constant 0 : i32
    %c0_i32_0 = arith.constant 0 : i32
    return %arg0, %c0_i32 : i32, i32
  }
  func.func @transform_1(%arg0: i32) -> (i32, i32) {
    %c0_i32 = arith.constant 0 : i32
    %c0_i32_0 = arith.constant 0 : i32
    %c0_i32_1 = arith.constant 0 : i32
    return %c0_i32, %c0_i32_0 : i32, i32
  }
  func.func @transform_2(%arg0: i32) -> (i32, i32) {
    %c0_i32 = arith.constant 0 : i32
    %c0_i32_0 = arith.constant 0 : i32
    %c0_i32_1 = arith.constant 0 : i32
    return %c0_i32, %c0_i32_0 : i32, i32
  }
  func.func @transform_3(%arg0: i32) -> (i32, i32) {
    %c0_i32 = arith.constant 0 : i32
    %c0_i32_0 = arith.constant 0 : i32
    %c0_i32_1 = arith.constant 0 : i32
    return %c0_i32, %c0_i32_0 : i32, i32
  }
  func.func @transform_4(%arg0: i32) -> (i32, i32) {
    %c0_i32 = arith.constant 0 : i32
    %c0_i32_0 = arith.constant 0 : i32
    %c0_i32_1 = arith.constant 0 : i32
    return %c0_i32, %c0_i32_0 : i32, i32
  }
  func.func @transform_5(%arg0: i32) -> (i32, i32) {
    %c0_i32 = arith.constant 0 : i32
    %c0_i32_0 = arith.constant 0 : i32
    return %arg0, %c0_i32 : i32, i32
  }
}

</mosaic_0001>

<bundles_post_ra>
// kernel: tpu_custom_call.1
= control target key start
LH: loop header
LB: loop body
LE: loop exit
PB: predicated region body
PF: predicated region fallthrough
CT: control target
= control target key end

     0   :  { %10 = vsyncpa [#allocation3], 0  ;;  %s952_s0 = inlined_call_operand.hbm [shape: f32[16,32], index: 0, kind: input, shape index: {}]   ;;  %s953_s1 = inlined_call_operand.hbm [shape: f32[32,32], index: 1, kind: input, shape index: {}]   ;;  %s954_s2 = inlined_call_operand.vmem [shape: f32[1,32], index: 2, kind: input, shape index: {}]   ;;  %s955_s3 = inlined_call_operand.vmem [shape: f32[1,32], index: 3, kind: input, shape index: {}]   ;;  %s956_s4 = inlined_call_operand.vmem [shape: f32[1,32], index: 4, kind: input, shape index: {}]   ;;  %s957_s5 = inlined_call_operand.hbm [shape: f32[16,32], index: 5, kind: output, shape index: {}]  }
   0x1   :  { %12 = vsyncpa [#allocation3 + $0x1], 0 }
   0x2   :  { %13 = vsyncpa [#allocation6], 0 }
   0x3   :  { %14 = vsyncpa [#allocation4], 0 }
   0x4   :  { %16 = vsyncpa [#allocation4 + $0x1], 0  ;;  %s739_s18 = smov 0   ;;  %s741_s19 = smov 0  }
   0x5   :  { %s743_s20 = smov 0   ;;  %s745_s21 = smov 0  }
   0x6 LB: > { %s760_s22 = sadd.s32 4294967295, %s699_s21   ;;  %s467_s23 = sadd.s32 4294967294, %s699_s21   ;;  %s699_s21 = sphi %s745_s21, %s977_s21   ;;  %s695_s20 = sphi %s743_s20, %s976_s20   ;;  %s691_s19 = sphi %s741_s19, %s975_s19   ;;  %s687_s18 = sphi %s739_s18, %s974_s18  }
   0x7   : > { %p42_p0 = scmp.ne.s32.totalorder %s691_s19, %s687_s18  ;;  %p958_p1 = scmp.eq.s32.totalorder %s760_s22, 0 }
   0x8   : > { %p156_p3 = scmp.eq.s32.totalorder %s467_s23, 1  ;;  %p468_p5 = scmp.ge.s32.totalorder %s699_s21, 1 }
   0x9   : > { %p769_p4 = por %p958_p1, %p42_p0  ;;  %p163_p7 = scmp.lt.s32.totalorder %s699_s21, 3 }
   0xa   : > { %p774_p6 = por %p156_p3, %p42_p0  ;;  %s701_s27 = smov [#allocation5]  }
   0xb   : > { %s961_s24 = scalar_select %p769_p4, 1, 0 }
   0xc   : > { %s962_s25 = scalar_select %p774_p6, 1, 0 }
   0xd   : > { %p779_p8 = pnand %p468_p5, %p163_p7  ;;  %s175_s28 = sshll.u32 %s701_s27, 4  ;;  %s783_s28 = int_to_ptr.vmem [resolvable:$true] %s175_s28 }
   0xe   : > { %s795_s30 = sadd.s32 1, %s699_s21   ;;  %s29_s6 = sadd.s32 1, %s695_s20 }
   0xf   : > { %s963_s26 = scalar_select %p779_p8, 1, 0 }
  0x10   : > { %p515_p9 = pneg %p779_p8  ;;  %s26_s7 = ssub.s32 %s699_s21, %s795_s30 }
  0x11   : > { %s571_s10 = scalar_lea.hbm %s953_s1, 512 }
  0x12   : > { %p790_p11 = pnand %p515_p9, %p958_p1  ;;  %p572_p12 = scmp.ne.s32.totalorder %s953_s1, %s571_s10 }
  0x13   : > { %p578_p5 = scmp.lt.u32.totalorder %s571_s10, %s953_s1 }
  0x14   : > { %p573_p13 = pneg %p790_p11 }
  0x16   : > { %p574_p0 = pnand %p573_p13, %p572_p12 }
  0x18   : > { %p575_p3 = pneg %p574_p0 }
  0x1a   : > { %p580_p7 = pnand %p578_p5, %p575_p3 }
  0x1c   : > { %583 = shalt.err (!%p580_p7)
}
  0x1d   : > { %s584_s15 = scalar_lea.vmem %s783_s28, 512  ;;  %p592_p2 = scmp.lt.s32.totalorder %s783_s28, %s783_s28 }
  0x1e   : > { %p585_p9 = scmp.ne.s32.totalorder %s783_s28, %s584_s15  ;;  %p593_p6 = scmp.lt.s32.totalorder %s584_s15, %s584_s15 }
  0x20   : > { %p587_p10 = pnand %p585_p9, %p573_p13  ;;  %p594_p4 = por %p593_p6, %p592_p2 }
  0x22   : > { %p588_p1 = pneg %p587_p10 }
  0x24   : > { %p595_p8 = pnand %p594_p4, %p588_p1 }
  0x26   : > { %598 = shalt.err (!%p595_p8)
}
  0x27   : > { %s702_s16 = smov 128   ;;  %s703_s17 = smov 8  }
  0x28   : > { %518 = dma.hbm_to_vmem [thread:$0]  (!%p790_p11), %s953_s1, 512, %s783_s28, [#allocation6], %s702_s16, %s702_s16, %s703_s17  }
  0x29   : > { %p27_p2 = scmp.eq.s32.totalorder %s26_s7, 0  ;;  %p36_p1 = scmp.ne.s32.totalorder %s695_s20, %s691_s19 }
  0x2a   : > { %p37_p4 = scmp.eq.s32.totalorder %s699_s21, 0  ;;  %p528_p6 = scmp.lt.s32.totalorder %s699_s21, 2 }
  0x2b   : > { %s826_s8 = scalar_select %p27_p2, %s695_s20, %s29_s6  }
  0x2c   : > { %p38_p8 = por %p37_p4, %p36_p1  ;;  %p965_p10 = scmp.eq.s32.totalorder %s760_s22, 1 }
  0x2d   : > { %s198_s10 = sand.u32 1, %s695_s20   ;;  %s472_s11 = sshll.u32 %s699_s21, 7 }
  0x2e   : > { %p830_p12 = por %p965_p10, %p36_p1  ;;  %s471_s12 = sshll.u32 %s198_s10, 3 }
  0x2f   : > { %s839_s14 = scalar_lea.hbm %s952_s0, %s472_s11  ;;  %s202_s28 = scalar_lea.vmem [#allocation2], %s471_s12 }
  0x30   : > { %s209_s6 = sshll.u32 %s202_s28, 4  ;;  %p841_p11 = pnand %p528_p6, %p38_p8  ;;  %s845_s6 = int_to_ptr.vmem [resolvable:$true] %s209_s6 }
  0x31   : > { %s199_s15 = scalar_lea.sflag [#allocation3], %s198_s10  ;;  %s599_s16 = scalar_lea.hbm %s839_s14, 128 }
  0x32   : > { %p600_p13 = scmp.ne.s32.totalorder %s839_s14, %s599_s16  ;;  %p601_p0 = pneg %p841_p11 }
  0x33   : > { %s604_s27 = scalar_lea.hbm %s952_s0, 256  ;;  %p605_p7 = scmp.lt.u32.totalorder %s839_s14, %s952_s0 }
  0x34   : > { %p602_p3 = pnand %p601_p0, %p600_p13  ;;  %p606_p9 = scmp.lt.u32.totalorder %s604_s27, %s599_s16 }
  0x35   : > { %p608_p1 = scmp.lt.u32.totalorder %s599_s16, %s839_s14 }
  0x36   : > { %p603_p5 = pneg %p602_p3  ;;  %p607_p2 = por %p606_p9, %p605_p7 }
  0x38   : > { %p609_p4 = por %p608_p1, %p607_p2 }
  0x3a   : > { %p610_p6 = pnand %p609_p4, %p603_p5 }
  0x3c   : > { %613 = shalt.err (!%p610_p6)
}
  0x3d   : > { %s614_s10 = scalar_lea.vmem %s845_s6, 128  ;;  %s704_s29 = smov [#allocation2]  }
  0x3e   : > { %p615_p8 = scmp.ne.s32.totalorder %s845_s6, %s614_s10  ;;  %s619_s13 = sshll.u32 %s704_s29, 4  ;;  %s620_s13 = int_to_ptr.vmem [resolvable:$false] %s619_s13 }
  0x3f   : > { %s621_s28 = scalar_lea.vmem %s620_s13, 256  ;;  %p622_p3 = scmp.lt.s32.totalorder %s845_s6, %s620_s13 }
  0x40   : > { %p617_p10 = pnand %p615_p8, %p601_p0  ;;  %p623_p7 = scmp.lt.s32.totalorder %s621_s28, %s614_s10 }
  0x42   : > { %p618_p13 = pneg %p617_p10  ;;  %p624_p9 = por %p623_p7, %p622_p3 }
  0x44   : > { %p625_p2 = pnand %p624_p9, %p618_p13 }
  0x46   : > { %628 = shalt.err (!%p625_p2)
}
  0x47   : > { %522 = dma.hbm_to_vmem [thread:$0]  (!%p841_p11), %s839_s14, 128, %s845_s6, %s199_s15  }
  0x48   : > { %p968_p5 = scmp.ne.s32.totalorder %s963_s26, 0 }
  0x49   : > { %s875_s16 = sand.u32 (!%p968_p5), 1, %s691_s19   ;;  %p969_p0 = scmp.ne.s32.totalorder (!%p968_p5), %s961_s24, 0 }
  0x4a   : > { %218 = sbr.rel (%p968_p5) target bundleno = 638 (0x27e), region = 40  ;;  %s474_s17 = sshll.u32 (!%p968_p5), %s875_s16, 3 }
  0x4b   : > { %s221_s23 = scalar_lea.sflag (!%p968_p5), [#allocation3], %s875_s16  ;;  %s224_s27 = scalar_lea.vmem (!%p968_p5), [#allocation2], %s474_s17 }
  0x51   : > { %674 = dma.done.wait (%p969_p0), %s221_s23, 128  }
  0x52   : > { %676 = vsyncadd (%p969_p0), %s221_s23, 4294967168  ;;  %p970_p11 = scmp.eq.s32.totalorder %s760_s22, 0 }
  0x54   : > { %678 = dma.done.wait (%p970_p11), [#allocation6], 512   ;;  %p971_p1 = pmov %p970_p11 }
  0x55   : > { %v705_v0 = vmov 0.0|0.0   ;;  %vm706_vm0 = vmmov 0   ;;  %v707_v1 = vmov 0.0   ;;  %v256_v2 = vld [vmem:[#allocation5] sm:$0xff]  ;;  %v257_v3 = vld [vmem:[#allocation5 + $0x8] sm:$0xff]  ;;  %v258_v4 = vld [vmem:[#allocation5 + $0x10] sm:$0xff] }
  0x56   : > { %680 = vsyncadd (%p971_p1), [#allocation6], 4294966784  ;;  %501 = vmatprep.subr.bf16.mxu0 %v705_v0  ;;  %498 = vmatprep.mubr.msk.f32.mxu0 %vm706_vm0, %v707_v1  ;;  %v502_v5 = vpack.c.bf16 %v257_v3, %v256_v2  ;;  %v259_v6 = vld [vmem:[#allocation5 + $0x18] sm:$0xff]  ;;  %vm260_vm1 = vcmask 261120   ;;  %v478_v10 = vld [vmem:[%s954_s2] ss:$0 sm:$0xff] }
  0x57   : > { %v505_v7 = vpack.c.bf16 %v259_v6, %v258_v4  ;;  %v255_v8 = vld [vmem:[%s224_s27] sm:$0xff]  ;;  %s482_s11 = sshll.u32 %s760_s22, 7  ;;  %s254_s12 = scalar_lea.vmem [#allocation7], %s474_s17 }
  0x58   : > { %503 = vmatpush3.bf16.msra.mxu0 %v502_v5  ;;  %v479_v24 = vld [vmem:[%s955_s3] ss:$0 sm:$0xff]  ;;  %s387_s10 = sshll.u32 %s254_s12, 4  ;;  %s907_s28 = scalar_lea.hbm %s957_s5, %s482_s11  ;;  %s909_s10 = int_to_ptr.vmem [resolvable:$true] %s387_s10 }
  0x59   : > { %504 = vmatprep.subr.bf16.mxu0 %v705_v0  ;;  %v480_v26 = vld [vmem:[%s956_s4] ss:$0 sm:$0xff]  ;;  %s374_s23 = scalar_lea.sflag [#allocation4], %s875_s16  ;;  %s629_s27 = scalar_lea.vmem %s909_s10, 128 }
  0x5a   : > { %p630_p4 = scmp.ne.s32.totalorder %s909_s10, %s629_s27  ;;  %s708_s22 = smov [#allocation7]  }
  0x5b   : > { %s633_s17 = sshll.u32 %s708_s22, 4  ;;  %s634_s17 = int_to_ptr.vmem [resolvable:$false] %s633_s17 }
  0x5c   : > { %506 = vmatpush3.bf16.msra.mxu0 %v505_v7  ;;  %p631_p6 = pnand %p630_p4, %p830_p12  ;;  %s635_s24 = scalar_lea.vmem %s634_s17, 256 }
  0x5d   : > { %p636_p10 = scmp.lt.s32.totalorder %s909_s10, %s634_s17  ;;  %p637_p13 = scmp.lt.s32.totalorder %s635_s24, %s629_s27 }
  0x5e   : > { %p632_p8 = pneg %p631_p6 }
  0x5f   : > { %499 = vmatmul.mubr.msk.f32.vlgmr.msra.gmra.mrb[0].mxu0 %vm260_vm1, %v255_v8  ;;  %p638_p3 = por %p637_p13, %p636_p10 }
  0x61   : > { %p639_p7 = pnand %p638_p3, %p632_p8 }
 0x132   : > { %v330_v9 = vpop.f32.mrb[0].mxu0 }
 0x133   : > { %v334_v11 = vadd.f32 %v330_v9, %v255_v8  ;;  %v500_v12 = vpop.f32.mrb[1].mxu0 }
 0x135   : > { %v342_v13 = vadd.f32 %v478_v10, %v334_v11 }
 0x137   : > { %v343_v14 = vsel %vm260_vm1, %v342_v13, 0.0 }
 0x138   : > { %344 = vadd.xlane.f32.xlu0 %v343_v14 }
 0x1c5   : > { %v345_v15 = vpop.xlane.xlu0 %344 }
 0x1c6   : > { %v346_v16 = vmul.f32 0.03125, %v345_v15 }
 0x1c8   : > { %v347_v17 = vsub.f32 %v342_v13, %v346_v16 }
 0x1ca   : > { %v348_v18 = vmul.f32 %v347_v17, %v347_v17 }
 0x1cc   : > { %v349_v19 = vsel %vm260_vm1, %v348_v18, 0.0 }
 0x1cd   : > { %350 = vadd.xlane.f32.xlu0 %v349_v19 }
 0x25a   : > { %v351_v20 = vpop.xlane.xlu0 %350 }
 0x25b   : > { %v352_v21 = vmul.f32 0.03125, %v351_v20 }
 0x25d   : > { %v353_v22 = vadd.f32 1e-05, %v352_v21 }
 0x25f   : > { %569 = vrsqrt.f32 %v353_v22 }
 0x269   : > { %v570_v23 = vpop.eup %569 }
 0x26a   : > { %v355_v25 = vmul.f32 %v570_v23, %v347_v17 }
 0x26c   : > { %v363_v27 = vmul.f32 %v479_v24, %v355_v25 }
 0x26e   : > { %v371_v28 = vadd.f32 %v480_v26, %v363_v27 }
 0x270   : > { %372 = vst.msk [vmem:[%s254_s12] sm:$0xff] %vm260_vm1, %v371_v28 }
 0x271   : > { %642 = shalt.err (!%p639_p7)
}
 0x272   : > { %s643_s16 = scalar_lea.hbm %s907_s28, 128  ;;  %s647_s6 = scalar_lea.hbm %s957_s5, 256 }
 0x273   : > { %p644_p9 = scmp.ne.s32.totalorder %s907_s28, %s643_s16  ;;  %p648_p0 = scmp.lt.u32.totalorder %s907_s28, %s957_s5 }
 0x274   : > { %p649_p11 = scmp.lt.u32.totalorder %s647_s6, %s643_s16  ;;  %p651_p4 = scmp.lt.u32.totalorder %s643_s16, %s907_s28 }
 0x275   : > { %p645_p2 = pnand %p644_p9, %p830_p12 }
 0x276   : > { %p650_p1 = por %p649_p11, %p648_p0 }
 0x277   : > { %p646_p5 = pneg %p645_p2 }
 0x278   : > { %p652_p6 = por %p651_p4, %p650_p1 }
 0x27a   : > { %p653_p8 = pnand %p652_p6, %p646_p5 }
 0x27c   : > { %656 = shalt.err (!%p653_p8)
}
 0x27d   : > { %513 = dma.vmem_to_hbm [thread:$0]  (%p830_p12), %s909_s10, 128, %s907_s28, %s374_s23  }
 0x27e PF: > { %s399_s11 = sand.u32 1, %s687_s18   ;;  %p972_p10 = scmp.ne.s32.totalorder %s962_s25, 0 }
 0x27f   : > { %p973_p13 = scmp.ge.s32.totalorder %s699_s21, 2  ;;  %s400_s12 = scalar_lea.sflag [#allocation4], %s399_s11 }
 0x281   : > { %p524_p3 = pnand %p973_p13, %p972_p10 }
 0x283   : > { %682 = dma.done.wait (!%p524_p3), %s400_s12, 128  }
 0x284   : > { %684 = vsyncadd (!%p524_p3), %s400_s12, 4294967168  ;;  %p19_p7 = scmp.ge.s32.totalorder %s795_s30, 4   ;;  %s974_s18 = smov %s691_s19 }
 0x285   : > { %s975_s19 = smov %s695_s20  ;;  %s976_s20 = smov %s826_s8 }
 0x286   : > { %s977_s21 = smov %s795_s30  ;;  %21 = sbr.rel (!%p19_p7) target bundleno = 6 (0x6), region = 89 }
 0x28d   :  { %405 = vsyncpa [#allocation3], 1 }
 0x28e   :  { %407 = vsyncpa [#allocation3 + $0x1], 1 }
 0x28f   :  { %408 = vsyncpa [#allocation6], 1 }
 0x290   :  { %409 = vsyncpa [#allocation4], 1 }
 0x291   :  { %411 = vsyncpa [#allocation4 + $0x1], 1 }

</bundles_post_ra>
